<compile_context>
chip_gen: v7x
topology: tpu7x:2x2x1
jax: 0.10.0
libtpu: 0.0.40
codegen_flags: <defaults>
</compile_context>

<pallas_src>
import functools

import jax
import jax.numpy as jnp
from jax import lax
from jax.experimental import pallas as pl
from jax.experimental.pallas import tpu as pltpu


def _tf_layernorm_kernel(x_ref, gamma_ref, beta_ref, o_ref, *, eps):
    # x_ref / o_ref: (NB, C, HW) VMEM tiles.  gamma_ref / beta_ref: (1, C, 1).
    x = x_ref[...].astype(jnp.float32)
    u = jnp.mean(x, axis=(1, 2), keepdims=True)          # per-sample mean, (NB, 1, 1)
    d = x - u
    s = jnp.mean(d * d, axis=(1, 2), keepdims=True)      # biased variance, (NB, 1, 1)
    inv = lax.rsqrt(s + eps)                             # rsqrt on the tiny reduction result
    g = gamma_ref[...].astype(jnp.float32)               # (1, C, 1): per-channel, lane-broadcast
    b = beta_ref[...].astype(jnp.float32)
    # Single fused scale/shift pass, exactly one dense store stream per element.
    o_ref[...] = (g * (d * inv) + b).astype(o_ref.dtype)


def _choose_samples_per_step(n, c, hw, itemsize, vmem_budget_bytes=8 << 20):
    """Pick samples-per-grid-step NB against a v7x-safe VMEM budget.

    Per step we hold roughly 2 (double-buffer) * 2 (x + out) * NB * C * HW * itemsize
    bytes; the 8 MiB budget leaves ample headroom under v7x's 32 MiB default
    scoped VMEM (64 MiB physical).
    """
    per_sample = 4 * c * hw * itemsize
    nb = max(1, vmem_budget_bytes // max(per_sample, 1))
    nb = min(nb, n)
    if n > 1:
        # Keep at least 2 grid steps so both v7x TensorCores get work.
        nb = min(nb, pl.cdiv(n, 2))
    return int(nb)


def tf_layer_norm(x, gamma, beta, variance_epsilon=1e-12):
    """TFLayerNorm with norm_axes=(1,2,3), param_axis=1 on an NCHW input.

    x:     (N, C, H, W)
    gamma: (C, 1, 1)
    beta:  (C, 1, 1)
    """
    N, C, H, W = x.shape
    HW = H * W
    D = C * HW

    # Glue: present each sample as a (C, HW) slab (sublane=C, lane=HW).
    x3 = x.reshape(N, C, HW)
    g3 = gamma.reshape(1, C, 1)     # natural size; broadcast inside the kernel
    b3 = beta.reshape(1, C, 1)

    itemsize = jnp.dtype(x.dtype).itemsize
    nb = _choose_samples_per_step(N, C, HW, itemsize)
    n_steps = pl.cdiv(N, nb)
    n_pad = n_steps * nb
    if n_pad != N:
        # Zero-padded rows are numerically safe (eps > 0) and sliced off below.
        x3 = jnp.pad(x3, ((0, n_pad - N), (0, 0), (0, 0)))

    cost = pl.CostEstimate(
        flops=8 * N * D,
        transcendentals=N,
        bytes_accessed=int((2 * N * D + 2 * C) * itemsize),
    )

    out = pl.pallas_call(
        functools.partial(_tf_layernorm_kernel, eps=variance_epsilon),
        out_shape=jax.ShapeDtypeStruct((n_pad, C, HW), x.dtype),
        grid_spec=pltpu.PrefetchScalarGridSpec(
            num_scalar_prefetch=0,
            grid=(n_steps,),
            in_specs=[
                pl.BlockSpec((nb, C, HW), lambda i: (i, 0, 0)),   # NB samples per step
                pl.BlockSpec((1, C, 1), lambda i: (0, 0, 0)),     # gamma (shared, natural size)
                pl.BlockSpec((1, C, 1), lambda i: (0, 0, 0)),     # beta  (shared, natural size)
            ],
            out_specs=pl.BlockSpec((nb, C, HW), lambda i: (i, 0, 0)),
        ),
        compiler_params=pltpu.CompilerParams(
            dimension_semantics=("parallel",),
        ),
        cost_estimate=cost,
    )(x3, g3, b3)

    if n_pad != N:
        out = out[:N]
    return out.reshape(N, C, H, W)


def _reference(x, gamma, beta, eps, norm_axes=(1, 2, 3)):
    x = x.astype(jnp.float32)
    u = jnp.mean(x, axis=norm_axes, keepdims=True)
    s = jnp.mean((x - u) ** 2, axis=norm_axes, keepdims=True)
    x_hat = (x - u) / jnp.sqrt(s + eps)
    # gamma/beta (C,1,1) broadcast against NCHW as (1,C,1,1)
    return gamma[None].astype(jnp.float32) * x_hat + beta[None].astype(jnp.float32)


if __name__ == "__main__":
    N, C, H, W = 2, 4, 16, 16
    eps = 1e-12

    key = jax.random.PRNGKey(0)
    x = jax.random.normal(key, (N, C, H, W), dtype=jnp.float32)

    # Parameter shapes from __init__ with norm_axes=(1,2,3), param_axis=1: (C, 1, 1).
    # Deterministic (non-trivial) init so the affine path is actually exercised.
    gamma = (1.0 + 0.1 * jnp.arange(C, dtype=jnp.float32)).reshape(C, 1, 1)
    beta = (0.05 * jnp.arange(C, dtype=jnp.float32)).reshape(C, 1, 1)

    out = tf_layer_norm(x, gamma, beta, variance_epsilon=eps)
    out = jax.block_until_ready(out)

    ref = _reference(x, gamma, beta, eps)
    assert out.shape == (N, C, H, W)
    assert jnp.allclose(out, ref, atol=1e-5, rtol=1e-5), "mismatch vs pure-JAX reference"

    print("KERNEL_OK")
</pallas_src>

<mosaic_0001>
module attributes {stable_mosaic.version = 11 : i64} {
  func.func @_tf_layernorm_kernel(%arg0: i32, %arg1: memref<1x4x256xf32, #tpu.memory_space<vmem>>, %arg2: memref<1x4x1xf32, #tpu.memory_space<vmem>>, %arg3: memref<1x4x1xf32, #tpu.memory_space<vmem>>, %arg4: memref<1x4x256xf32, #tpu.memory_space<vmem>>) attributes {dimension_semantics = [#tpu.dimension_semantics<parallel>], iteration_bounds = array<i64: 2>, scalar_prefetch = 0 : i64, scratch_operands = 0 : i64, tpu.core_type = #tpu.core_type<tc>, window_params = [{transform_indices = @transform_0, window_bounds = array<i64: 1, 4, 256>}, {pipeline_mode = #tpu.pipeline_mode<synchronous>, transform_indices = @transform_1, window_bounds = array<i64: 1, 4, 1>}, {pipeline_mode = #tpu.pipeline_mode<synchronous>, transform_indices = @transform_2, window_bounds = array<i64: 1, 4, 1>}, {transform_indices = @transform_3, window_bounds = array<i64: 1, 4, 256>}]} {
    %c0 = arith.constant 0 : index
    %c0_0 = arith.constant 0 : index
    %c0_1 = arith.constant 0 : index
    %0 = vector.load %arg1[%c0, %c0_0, %c0_1] : memref<1x4x256xf32, #tpu.memory_space<vmem>>, vector<1x4x256xf32>
    %cst = arith.constant dense<0.000000e+00> : vector<1xf32>
    %1 = vector.multi_reduction <add>, %0, %cst [1, 2] : vector<1x4x256xf32> to vector<1xf32>
    %2 = vector.shape_cast %1 : vector<1xf32> to vector<1x1x1xf32>
    %cst_2 = arith.constant 1.024000e+03 : f32
    %3 = vector.broadcast %cst_2 : f32 to vector<1x1x1xf32>
    %4 = arith.divf %2, %3 : vector<1x1x1xf32>
    %5 = vector.broadcast %4 : vector<1x1x1xf32> to vector<1x4x256xf32>
    %6 = arith.subf %0, %5 : vector<1x4x256xf32>
    %7 = arith.mulf %6, %6 : vector<1x4x256xf32>
    %cst_3 = arith.constant dense<0.000000e+00> : vector<1xf32>
    %8 = vector.multi_reduction <add>, %7, %cst_3 [1, 2] : vector<1x4x256xf32> to vector<1xf32>
    %9 = vector.shape_cast %8 : vector<1xf32> to vector<1x1x1xf32>
    %cst_4 = arith.constant 1.024000e+03 : f32
    %10 = vector.broadcast %cst_4 : f32 to vector<1x1x1xf32>
    %11 = arith.divf %9, %10 : vector<1x1x1xf32>
    %cst_5 = arith.constant 9.99999996E-13 : f32
    %12 = vector.broadcast %cst_5 : f32 to vector<1x1x1xf32>
    %13 = arith.addf %11, %12 : vector<1x1x1xf32>
    %14 = math.rsqrt %13 : vector<1x1x1xf32>
    %c0_6 = arith.constant 0 : index
    %c0_7 = arith.constant 0 : index
    %c0_8 = arith.constant 0 : index
    %15 = vector.load %arg2[%c0_6, %c0_7, %c0_8] : memref<1x4x1xf32, #tpu.memory_space<vmem>>, vector<1x4x1xf32>
    %c0_9 = arith.constant 0 : index
    %c0_10 = arith.constant 0 : index
    %c0_11 = arith.constant 0 : index
    %16 = vector.load %arg3[%c0_9, %c0_10, %c0_11] : memref<1x4x1xf32, #tpu.memory_space<vmem>>, vector<1x4x1xf32>
    %17 = vector.broadcast %14 : vector<1x1x1xf32> to vector<1x4x256xf32>
    %18 = arith.mulf %6, %17 : vector<1x4x256xf32>
    %19 = vector.broadcast %15 : vector<1x4x1xf32> to vector<1x4x256xf32>
    %20 = arith.mulf %19, %18 : vector<1x4x256xf32>
    %21 = vector.broadcast %16 : vector<1x4x1xf32> to vector<1x4x256xf32>
    %22 = arith.addf %20, %21 : vector<1x4x256xf32>
    %c0_12 = arith.constant 0 : index
    %c0_13 = arith.constant 0 : index
    %c0_14 = arith.constant 0 : index
    %23 = vector.load %arg4[%c0_12, %c0_13, %c0_14] : memref<1x4x256xf32, #tpu.memory_space<vmem>>, vector<1x4x256xf32>
    tpu.vector_store %arg4[%c0_12, %c0_13, %c0_14], %22 {strides = array<i32>} : memref<1x4x256xf32, #tpu.memory_space<vmem>>, vector<1x4x256xf32>,
    return
  }
  func.func @transform_0(%arg0: i32) -> (i32, i32, i32) {
    %c0_i32 = arith.constant 0 : i32
    %c0_i32_0 = arith.constant 0 : i32
    %c0_i32_1 = arith.constant 0 : i32
    return %arg0, %c0_i32, %c0_i32_0 : i32, i32, i32
  }
  func.func @transform_1(%arg0: i32) -> (i32, i32, i32) {
    %c0_i32 = arith.constant 0 : i32
    %c0_i32_0 = arith.constant 0 : i32
    %c0_i32_1 = arith.constant 0 : i32
    %c0_i32_2 = arith.constant 0 : i32
    return %c0_i32, %c0_i32_0, %c0_i32_1 : i32, i32, i32
  }
  func.func @transform_2(%arg0: i32) -> (i32, i32, i32) {
    %c0_i32 = arith.constant 0 : i32
    %c0_i32_0 = arith.constant 0 : i32
    %c0_i32_1 = arith.constant 0 : i32
    %c0_i32_2 = arith.constant 0 : i32
    return %c0_i32, %c0_i32_0, %c0_i32_1 : i32, i32, i32
  }
  func.func @transform_3(%arg0: i32) -> (i32, i32, i32) {
    %c0_i32 = arith.constant 0 : i32
    %c0_i32_0 = arith.constant 0 : i32
    %c0_i32_1 = arith.constant 0 : i32
    return %arg0, %c0_i32, %c0_i32_0 : i32, i32, i32
  }
}

</mosaic_0001>

<bundles_post_ra>
// kernel: tpu_custom_call.1
= control target key start
LH: loop header
LB: loop body
LE: loop exit
PB: predicated region body
PF: predicated region fallthrough
CT: control target
= control target key end

     0   :  { %8 = vsyncpa [#allocation3], 0  ;;  %s698_s0 = inlined_call_operand.hbm [shape: f32[2,4,256], index: 0, kind: input, shape index: {}]   ;;  %s699_s1 = inlined_call_operand.vmem [shape: f32[1,4,1], index: 1, kind: input, shape index: {}]   ;;  %s700_s2 = inlined_call_operand.vmem [shape: f32[1,4,1], index: 2, kind: input, shape index: {}]   ;;  %s701_s3 = inlined_call_operand.hbm [shape: f32[2,4,256], index: 3, kind: output, shape index: {}]  }
   0x1   :  { %10 = vsyncpa [#allocation3 + $0x1], 0 }
   0x2   :  { %11 = vsyncpa [#allocation4], 0 }
   0x3   :  { %13 = vsyncpa [#allocation4 + $0x1], 0  ;;  %s523_s12 = smov 0   ;;  %s525_s13 = smov 0  }
   0x4   :  { %s527_s14 = smov 0   ;;  %s529_s15 = smov 0  }
   0x5 LB: > { %s544_s16 = sadd.s32 4294967295, %s498_s15   ;;  %s334_s17 = sadd.s32 4294967294, %s498_s15   ;;  %s498_s15 = sphi %s529_s15, %s716_s15   ;;  %s494_s14 = sphi %s527_s14, %s715_s14   ;;  %s490_s13 = sphi %s525_s13, %s714_s13   ;;  %s486_s12 = sphi %s523_s12, %s713_s12  }
   0x6   : > { %s548_s18 = sadd.s32 1, %s498_s15   ;;  %s26_s19 = sadd.s32 1, %s494_s14 }
   0x7   : > { %s23_s20 = ssub.s32 %s498_s15, %s548_s18  ;;  %p33_p0 = scmp.ne.s32.totalorder %s494_s14, %s490_s13 }
   0x8   : > { %p24_p1 = scmp.eq.s32.totalorder %s23_s20, 0  ;;  %p34_p2 = scmp.eq.s32.totalorder %s498_s15, 0 }
   0x9   : > { %p39_p3 = scmp.ne.s32.totalorder %s490_s13, %s486_s12  ;;  %p40_p4 = scmp.eq.s32.totalorder %s544_s16, 0 }
   0xa   : > { %s560_s21 = scalar_select %p24_p1, %s494_s14, %s26_s19  }
   0xb   : > { %p562_p5 = por %p34_p2, %p33_p0  ;;  %p566_p6 = por %p40_p4, %p39_p3 }
   0xc   : > { %p105_p7 = scmp.eq.s32.totalorder %s544_s16, 1  ;;  %p111_p8 = scmp.eq.s32.totalorder %s334_s17, 1 }
   0xd   : > { %p362_p10 = scmp.lt.s32.totalorder %s498_s15, 2  ;;  %s137_s26 = sand.u32 1, %s494_s14  }
   0xe   : > { %p573_p11 = por %p105_p7, %p33_p0  ;;  %p577_p12 = por %p111_p8, %p39_p3 }
   0xf   : > { %s348_s27 = sshll.u32 %s498_s15, 7  ;;  %s337_s28 = sshll.u32 %s137_s26, 3 }
  0x10   : > { %s705_s24 = scalar_select %p573_p11, 1, 0 }
  0x11   : > { %s706_s25 = scalar_select %p577_p12, 1, 0 }
  0x12   : > { %s586_s4 = scalar_lea.hbm %s698_s0, %s348_s27  ;;  %s141_s5 = scalar_lea.vmem [#allocation2], %s337_s28 }
  0x13   : > { %s149_s6 = sshll.u32 %s141_s5, 4  ;;  %p590_p13 = pnand %p362_p10, %p562_p5  ;;  %s594_s6 = int_to_ptr.vmem [resolvable:$true] %s149_s6 }
  0x14   : > { %s138_s8 = scalar_lea.sflag [#allocation3], %s137_s26  ;;  %s402_s9 = scalar_lea.hbm %s586_s4, 128 }
  0x15   : > { %p403_p2 = scmp.ne.s32.totalorder %s586_s4, %s402_s9  ;;  %p404_p3 = pneg %p590_p13 }
  0x16   : > { %s407_s17 = scalar_lea.hbm %s698_s0, 256  ;;  %p408_p5 = scmp.lt.u32.totalorder %s586_s4, %s698_s0 }
  0x17   : > { %p405_p4 = pnand %p404_p3, %p403_p2  ;;  %p409_p8 = scmp.lt.u32.totalorder %s407_s17, %s402_s9 }
  0x18   : > { %p411_p9 = scmp.lt.u32.totalorder %s402_s9, %s586_s4 }
  0x19   : > { %p406_p7 = pneg %p405_p4  ;;  %p410_p10 = por %p409_p8, %p408_p5 }
  0x1b   : > { %p412_p0 = por %p411_p9, %p410_p10 }
  0x1d   : > { %p413_p1 = pnand %p412_p0, %p406_p7 }
  0x1f   : > { %416 = shalt.err (!%p413_p1)
}
  0x20   : > { %s417_s22 = scalar_lea.vmem %s594_s6, 128  ;;  %s500_s26 = smov [#allocation2]  }
  0x21   : > { %p418_p2 = scmp.ne.s32.totalorder %s594_s6, %s417_s22  ;;  %s422_s27 = sshll.u32 %s500_s26, 4  ;;  %s423_s27 = int_to_ptr.vmem [resolvable:$false] %s422_s27 }
  0x22   : > { %s424_s28 = scalar_lea.vmem %s423_s27, 256  ;;  %p425_p11 = scmp.lt.s32.totalorder %s594_s6, %s423_s27 }
  0x23   : > { %p420_p4 = pnand %p418_p2, %p404_p3  ;;  %p426_p5 = scmp.lt.s32.totalorder %s424_s28, %s417_s22 }
  0x25   : > { %p421_p12 = pneg %p420_p4  ;;  %p427_p8 = por %p426_p5, %p425_p11 }
  0x27   : > { %p428_p9 = pnand %p427_p8, %p421_p12 }
  0x29   : > { %431 = shalt.err (!%p428_p9)
}
  0x2a   : > { %357 = dma.hbm_to_vmem [thread:$0]  (!%p590_p13), %s586_s4, 128, %s594_s6, %s138_s8  }
  0x2b   : > { %p708_p0 = scmp.lt.s32.totalorder %s498_s15, 3  ;;  %p709_p1 = scmp.ge.s32.totalorder %s498_s15, 1 }
  0x2d   : > { %p155_p3 = pnand %p709_p1, %p708_p0 }
  0x2e   : > { %s628_s29 = sand.u32 (!%p155_p3), 1, %s490_s13  }
  0x2f   : > { %158 = sbr.rel (%p155_p3) target bundleno = 419 (0x1a3), region = 32  ;;  %s341_s30 = sshll.u32 (!%p155_p3), %s628_s29, 3 }
  0x30   : > { %s161_s5 = scalar_lea.sflag (!%p155_p3), [#allocation3], %s628_s29  ;;  %s164_s7 = scalar_lea.vmem (!%p155_p3), [#allocation2], %s341_s30 }
  0x36   : > { %477 = dma.done.wait (%p566_p6), %s161_s5, 128  }
  0x37   : > { %479 = vsyncadd (%p566_p6), %s161_s5, 4294967168  ;;  %vm191_vm0 = vcmask 1043456   ;;  %v187_v0 = vld [vmem:[%s164_s7] sm:$0xff]  ;;  %v501_v6 = vmov 0   ;;  %s349_s9 = sshll.u32 %s544_s16, 7  ;;  %s186_s10 = scalar_lea.vmem [#allocation5], %s341_s30 }
  0x38   : > { %v189_v1 = vcombine.high %v187_v0, %v187_v0  ;;  %v192_v2 = vsel %vm191_vm0, %v187_v0, 0.0  ;;  %v224_v5 = vld [vmem:[%s699_s1] sm:$0xf]  ;;  %397 = vset.pattern.permute.xlu1 %v501_v6  ;;  %398 = vset.pattern.permute.xlu0 %v501_v6  ;;  %s264_s11 = sshll.u32 %s186_s10, 4  ;;  %s654_s20 = scalar_lea.hbm %s701_s3, %s349_s9  ;;  %s656_s11 = int_to_ptr.vmem [resolvable:$true] %s264_s11 }
  0x39   : > { %229 = vperm.xlu1 %397, %v224_v5   ;;  %v225_v7 = vld [vmem:[%s700_s2] sm:$0xf]  ;;  %s250_s22 = scalar_lea.sflag [#allocation4], %s628_s29  ;;  %s432_s26 = scalar_lea.vmem %s656_s11, 128 }
  0x3a   : > { %v193_v3 = vsel %vm191_vm0, %v189_v1, 0.0  ;;  %p433_p6 = scmp.ne.s32.totalorder %s656_s11, %s432_s26  ;;  %p710_p11 = scmp.ne.s32.totalorder %s705_s24, 0 }
  0x3b   : > { %v194_v4 = vadd.f32 %v193_v3, %v192_v2  ;;  %s502_s16 = smov [#allocation5]  }
  0x3c   : > { %p434_p12 = pnand %p433_p6, %p710_p11  ;;  %s436_s27 = sshll.u32 %s502_s16, 4  ;;  %s437_s27 = int_to_ptr.vmem [resolvable:$false] %s436_s27 }
  0x3d   : > { %195 = vadd.xlane.f32.xlu0 %v194_v4  ;;  %239 = vperm.xlu1 %397, %v225_v7   ;;  %s438_s28 = scalar_lea.vmem %s437_s27, 256  ;;  %p439_p7 = scmp.lt.s32.totalorder %s656_s11, %s437_s27 }
  0x3e   : > { %p435_p13 = pneg %p434_p12  ;;  %p440_p10 = scmp.lt.s32.totalorder %s438_s28, %s432_s26 }
  0x40   : > { %p441_p2 = por %p440_p10, %p439_p7 }
  0x42   : > { %p442_p4 = pnand %p441_p2, %p435_p13 }
  0xb8   : > { %v230_v32 = vpop.permute.xlu1 %229 }
  0xbc   : > { %v240_v37 = vpop.permute.xlu1 %239 }
  0xca   : > { %v196_v8 = vpop.xlane.xlu0 %195 }
  0xcb   : > { %v197_v9 = vrot.slane %v196_v8, 4 }
  0xcd   : > { %v198_v10 = vadd.f32 %v197_v9, %v196_v8 }
  0xcf   : > { %v199_v11 = vrot.slane %v198_v10, 2 }
  0xd1   : > { %v200_v12 = vadd.f32 %v199_v11, %v198_v10 }
  0xd3   : > { %v201_v13 = vrot.slane %v200_v12, 1 }
  0xd5   : > { %v202_v14 = vadd.f32 %v201_v13, %v200_v12 }
  0xd7   : > { %v204_v15 = vmul.f32 0.0009765625, %v202_v14 }
  0xd9   : > { %v205_v16 = vsub.f32 %v187_v0, %v204_v15 }
  0xdb   : > { %v206_v17 = vmul.f32 %v205_v16, %v205_v16 }
  0xdd   : > { %v208_v18 = vcombine.high %v206_v17, %v206_v17  ;;  %v210_v19 = vsel %vm191_vm0, %v206_v17, 0.0 }
  0xdf   : > { %v211_v20 = vsel %vm191_vm0, %v208_v18, 0.0 }
  0xe0   : > { %v212_v21 = vadd.f32 %v211_v20, %v210_v19 }
  0xe2   : > { %213 = vadd.xlane.f32.xlu0 %v212_v21 }
 0x16f   : > { %v214_v22 = vpop.xlane.xlu0 %213 }
 0x170   : > { %v215_v23 = vrot.slane %v214_v22, 4 }
 0x172   : > { %v216_v24 = vadd.f32 %v215_v23, %v214_v22 }
 0x174   : > { %v217_v25 = vrot.slane %v216_v24, 2 }
 0x176   : > { %v218_v26 = vadd.f32 %v217_v25, %v216_v24 }
 0x178   : > { %v219_v27 = vrot.slane %v218_v26, 1 }
 0x17a   : > { %v220_v28 = vadd.f32 %v219_v27, %v218_v26 }
 0x17c   : > { %v221_v29 = vmul.f32 0.0009765625, %v220_v28 }
 0x17e   : > { %v222_v30 = vadd.f32 1e-12, %v221_v29 }
 0x180   : > { %400 = vrsqrt.f32 %v222_v30 }
 0x18a   : > { %v401_v31 = vpop.eup %400 }
 0x18b   : > { %v226_v33 = vmul.f32 %v401_v31, %v205_v16 }
 0x18d   : > { %v233_v34 = vcombine.high %v226_v33, %v226_v33  ;;  %v235_v35 = vmul.f32 %v230_v32, %v226_v33 }
 0x18f   : > { %v236_v36 = vmul.f32 %v233_v34, %v230_v32  ;;  %v242_v38 = vadd.f32 %v240_v37, %v235_v35 }
 0x191   : > { %v243_v39 = vadd.f32 %v240_v37, %v236_v36 }
 0x193   : > { %v246_v40 = vcombine.low %v242_v38, %v243_v39 }
 0x195   : > { %248 = vst [vmem:[%s186_s10] sm:$0xff] %v246_v40 }
 0x196   : > { %445 = shalt.err (!%p442_p4)
}
 0x197   : > { %s446_s29 = scalar_lea.hbm %s654_s20, 128  ;;  %s450_s7 = scalar_lea.hbm %s701_s3, 256 }
 0x198   : > { %p447_p5 = scmp.ne.s32.totalorder %s654_s20, %s446_s29  ;;  %p451_p0 = scmp.lt.u32.totalorder %s654_s20, %s701_s3 }
 0x199   : > { %p452_p1 = scmp.lt.u32.totalorder %s450_s7, %s446_s29  ;;  %p454_p6 = scmp.lt.u32.totalorder %s446_s29, %s654_s20 }
 0x19a   : > { %p448_p8 = pnand %p447_p5, %p710_p11 }
 0x19b   : > { %p453_p3 = por %p452_p1, %p451_p0 }
 0x19c   : > { %p449_p9 = pneg %p448_p8 }
 0x19d   : > { %p455_p12 = por %p454_p6, %p453_p3 }
 0x19f   : > { %p456_p13 = pnand %p455_p12, %p449_p9 }
 0x1a1   : > { %459 = shalt.err (!%p456_p13)
}
 0x1a2   : > { %352 = dma.vmem_to_hbm [thread:$0]  (%p710_p11), %s656_s11, 128, %s654_s20, %s250_s22  }
 0x1a3 PF: > { %s276_s8 = sand.u32 1, %s486_s12   ;;  %p711_p7 = scmp.ne.s32.totalorder %s706_s25, 0 }
 0x1a4   : > { %p712_p10 = scmp.ge.s32.totalorder %s498_s15, 2  ;;  %s277_s23 = scalar_lea.sflag [#allocation4], %s276_s8 }
 0x1a6   : > { %p359_p2 = pnand %p712_p10, %p711_p7 }
 0x1a8   : > { %481 = dma.done.wait (!%p359_p2), %s277_s23, 128  }
 0x1a9   : > { %483 = vsyncadd (!%p359_p2), %s277_s23, 4294967168  ;;  %p16_p4 = scmp.ge.s32.totalorder %s548_s18, 4   ;;  %s713_s12 = smov %s490_s13 }
 0x1aa   : > { %s714_s13 = smov %s494_s14  ;;  %s715_s14 = smov %s560_s21 }
 0x1ab   : > { %s716_s15 = smov %s548_s18  ;;  %18 = sbr.rel (!%p16_p4) target bundleno = 5 (0x5), region = 77 }
 0x1b2   :  { %282 = vsyncpa [#allocation3], 1 }
 0x1b3   :  { %284 = vsyncpa [#allocation3 + $0x1], 1 }
 0x1b4   :  { %285 = vsyncpa [#allocation4], 1 }
 0x1b5   :  { %287 = vsyncpa [#allocation4 + $0x1], 1 }

</bundles_post_ra>
